<compile_context>
chip_gen: v6e
topology: v6e:2x2x1
jax: 0.10.0
libtpu: 0.0.40
codegen_flags: <defaults>
</compile_context>

<pallas_src>
import functools
import math

import jax
import jax.numpy as jnp
from jax.experimental import pallas as pl
from jax.experimental.pallas import tpu as pltpu

_MAX_VAL = 1.0                      # images assumed in [0, 1] (pyiqa default)
_C1 = (0.01 * _MAX_VAL) ** 2        # SSIM stabilizers
_C2 = (0.03 * _MAX_VAL) ** 2
_TINY = 1e-12
_INV_LN10 = 1.0 / math.log(10.0)
_LANES = 128
_TILE_ROWS_MAX = 2048               # per review: 1024-2048 row tiles
_TILE_ROWS_MIN = 256
# 2 inputs x 2 pipeline buffers of one tile must stay under this budget.
_PIPELINE_BUDGET_BYTES = 16 * 1024 * 1024


def _round_up(a, b):
    return ((a + b - 1) // b) * b


def _iqa_kernel(x_ref, y_ref, out_ref, acc_ref, *, num_pixels, tail_rows):
    """Streaming per-image PSNR + (global-moment) SSIM.

    x_ref / y_ref : (1, C, TILE_ROWS, 128) blocks (native dtype; cast here)
    out_ref       : (1, 2, 128) f32; row 0 = PSNR, row 1 = SSIM (lane-broadcast)
    acc_ref       : (6, C, 128) f32 scratch of lane-parallel partial sums
                    [Sx, Sy, Sx2, Sy2, Sxy, S(x-y)^2] per channel.
    tail_rows     : static; number of valid rows in the (ragged) last tile,
                    0 if every tile is full.
    """
    k = pl.program_id(1)
    last = pl.num_programs(1) - 1

    @pl.when(k == 0)
    def _init():
        acc_ref[...] = jnp.zeros_like(acc_ref)

    x = x_ref[0].astype(jnp.float32)          # (C, TILE_ROWS, 128)
    y = y_ref[0].astype(jnp.float32)

    def _accumulate(xv, yv):
        # Per-tile: reduce only the tile-row (sublane) axis; keep lanes parallel.
        d = xv - yv
        acc_ref[0] += jnp.sum(xv, axis=1)
        acc_ref[1] += jnp.sum(yv, axis=1)
        acc_ref[2] += jnp.sum(xv * xv, axis=1)
        acc_ref[3] += jnp.sum(yv * yv, axis=1)
        acc_ref[4] += jnp.sum(xv * yv, axis=1)
        acc_ref[5] += jnp.sum(d * d, axis=1)   # exact squared error for PSNR

    if tail_rows:
        # Only the last tile overhangs the array; mask its out-of-bounds rows.
        @pl.when(k != last)
        def _full_tile():
            _accumulate(x, y)

        @pl.when(k == last)
        def _partial_tile():
            row = jax.lax.broadcasted_iota(jnp.int32, x.shape, 1)
            m = row < tail_rows
            zero = jnp.float32(0.0)
            _accumulate(jnp.where(m, x, zero), jnp.where(m, y, zero))
    else:
        _accumulate(x, y)

    @pl.when(k == last)
    def _finalize():
        c = acc_ref.shape[1]
        inv_hw = jnp.float32(1.0 / num_pixels)

        # Single lane-axis reduce per statistic, once per image.
        s_x = jnp.sum(acc_ref[0], axis=-1, keepdims=True)    # (C, 1)
        s_y = jnp.sum(acc_ref[1], axis=-1, keepdims=True)
        s_xx = jnp.sum(acc_ref[2], axis=-1, keepdims=True)
        s_yy = jnp.sum(acc_ref[3], axis=-1, keepdims=True)
        s_xy = jnp.sum(acc_ref[4], axis=-1, keepdims=True)
        sq_err = jnp.sum(acc_ref[5])                          # all channels

        # ---------------- PSNR from the dedicated (x-y)^2 sum ----------------
        mse = sq_err * inv_hw * jnp.float32(1.0 / c)
        psnr_finite = (10.0 * _INV_LN10) * jnp.log(
            (_MAX_VAL * _MAX_VAL) / jnp.maximum(mse, _TINY))
        psnr = jnp.where(mse > 0.0, psnr_finite, jnp.float32(jnp.inf))

        # ------------- SSIM from whole-image moments, per channel ------------
        mu_x = s_x * inv_hw
        mu_y = s_y * inv_hw
        var_x = s_xx * inv_hw - mu_x * mu_x
        var_y = s_yy * inv_hw - mu_y * mu_y
        cov = s_xy * inv_hw - mu_x * mu_y
        ssim_c = ((2.0 * mu_x * mu_y + _C1) * (2.0 * cov + _C2)) / (
            (mu_x * mu_x + mu_y * mu_y + _C1) * (var_x + var_y + _C2))
        ssim = jnp.sum(ssim_c) * jnp.float32(1.0 / c)

        # Single merged output store: row 0 = PSNR, row 1 = SSIM.
        row_idx = jax.lax.broadcasted_iota(jnp.int32, (2, _LANES), 0)
        out_ref[0] = jnp.where(row_idx == 0, psnr, ssim).astype(out_ref.dtype)


def iqa_metric(output, target, metric_names=("psnr", "ssim"), calc_mean=True):
    """JAX/Pallas equivalent of IQA_Metric.forward(output, target)."""
    assert output.shape == target.shape, "output/target shapes must match"
    n, c, h, w = output.shape
    hw = h * w
    rows = pl.cdiv(hw, _LANES)

    # Sublane alignment follows the dtype packing (8 f32 / 16 bf16 / 32 int8).
    itemsize = jnp.dtype(output.dtype).itemsize
    sublane_align = max(8, 32 // itemsize)

    # Tile target: as large as the pipelined-VMEM budget allows, capped at 2048.
    row_bytes = 2 * 2 * c * _LANES * itemsize      # 2 inputs x 2 buffers
    target_rows = max(_TILE_ROWS_MIN,
                      min(_TILE_ROWS_MAX, _PIPELINE_BUDGET_BYTES // row_bytes))

    # Pick tile_rows to minimize overhang (no host padding of the row axis).
    if target_rows >= rows:
        tile_rows, num_tiles = rows, 1             # full dim: exempt from /8 rule
    else:
        num_tiles = pl.cdiv(rows, target_rows)
        tile_rows = _round_up(pl.cdiv(rows, num_tiles), sublane_align)
        if tile_rows >= rows:
            tile_rows, num_tiles = rows, 1
        else:
            num_tiles = pl.cdiv(rows, tile_rows)
    tail_rows = rows - (num_tiles - 1) * tile_rows
    if tail_rows == tile_rows:
        tail_rows = 0                              # evenly divided, no masking

    lane_pad = rows * _LANES - hw

    def _prep(img):
        # Free bitcast-reshape (no copy) whenever H*W % 128 == 0.
        flat = img.reshape(n, c, hw)               # native dtype (cast in-kernel)
        if lane_pad:
            # TODO(synk): only hit when H*W % 128 != 0; this still copies the
            # array once -- a fully pad-free path would need a flat lane layout.
            flat = jnp.pad(flat, ((0, 0), (0, 0), (0, lane_pad)))
        return flat.reshape(n, c, rows, _LANES)

    x = _prep(output)
    y = _prep(target)

    kernel = functools.partial(_iqa_kernel, num_pixels=hw, tail_rows=tail_rows)
    blk = (1, c, tile_rows, _LANES)

    scores = pl.pallas_call(
        kernel,
        out_shape=jax.ShapeDtypeStruct((n, 2, _LANES), jnp.float32),
        grid_spec=pltpu.PrefetchScalarGridSpec(
            num_scalar_prefetch=0,
            grid=(n, num_tiles),
            in_specs=[pl.BlockSpec(blk, lambda i, k: (i, 0, k, 0)),
                      pl.BlockSpec(blk, lambda i, k: (i, 0, k, 0))],
            out_specs=pl.BlockSpec((1, 2, _LANES), lambda i, k: (i, 0, 0)),
            scratch_shapes=[pltpu.VMEM((6, c, _LANES), jnp.float32)]),
        compiler_params=pltpu.CompilerParams(
            dimension_semantics=("parallel", "arbitrary"),
            vmem_limit_bytes=32 * 1024 * 1024),
    )(x, y)

    all_scores = {"psnr": scores[:, 0, 0], "ssim": scores[:, 1, 0]}
    metric_scores = {m: v for m, v in all_scores.items() if m in metric_names}

    if calc_mean:
        return {m: jnp.mean(v) for m, v in metric_scores.items()}
    return metric_scores


if __name__ == "__main__":
    key = jax.random.PRNGKey(0)
    k1, k2 = jax.random.split(key)
    # small shapes: batch=2, channels=4, spatial=16x16, values in [0, 1]
    out_img = jax.random.uniform(k1, (2, 4, 16, 16), dtype=jnp.float32)
    tgt_img = jnp.clip(
        out_img + 0.05 * jax.random.normal(k2, (2, 4, 16, 16), jnp.float32),
        0.0, 1.0)

    scores = iqa_metric(out_img, tgt_img,
                        metric_names=("psnr", "ssim"), calc_mean=True)
    jax.block_until_ready(scores)
    print("KERNEL_OK")
</pallas_src>

<mosaic_0001>
module attributes {stable_mosaic.version = 11 : i64} {
  func.func @_iqa_kernel(%arg0: i32, %arg1: i32, %arg2: memref<1x4x2x128xf32, #tpu.memory_space<vmem>>, %arg3: memref<1x4x2x128xf32, #tpu.memory_space<vmem>>, %arg4: memref<1x2x128xf32, #tpu.memory_space<vmem>>, %arg5: memref<6x4x128xf32, #tpu.memory_space<vmem>>) attributes {dimension_semantics = [#tpu.dimension_semantics<parallel>, #tpu.dimension_semantics<arbitrary>], iteration_bounds = array<i64: 2, 1>, scalar_prefetch = 0 : i64, scratch_operands = 1 : i64, tpu.core_type = #tpu.core_type<tc>, window_params = [{transform_indices = @transform_0, window_bounds = array<i64: 1, 4, 2, 128>}, {transform_indices = @transform_1, window_bounds = array<i64: 1, 4, 2, 128>}, {transform_indices = @transform_2, window_bounds = array<i64: 1, 2, 128>}]} {
    %c0_i32 = arith.constant 0 : i32
    %0 = arith.cmpi eq, %arg1, %c0_i32 : i32
    %1 = arith.extui %0 : i1 to i32
    %c0_i32_0 = arith.constant 0 : i32
    %2 = arith.cmpi ne, %1, %c0_i32_0 : i32
    scf.if %2 {
      %cst_46 = arith.constant 0.000000e+00 : f32
      %57 = vector.broadcast %cst_46 : f32 to vector<6x4x128xf32>
      %c0_47 = arith.constant 0 : index
      %c0_48 = arith.constant 0 : index
      %c0_49 = arith.constant 0 : index
      %58 = vector.load %arg5[%c0_47, %c0_48, %c0_49] : memref<6x4x128xf32, #tpu.memory_space<vmem>>, vector<6x4x128xf32>
      tpu.vector_store %arg5[%c0_47, %c0_48, %c0_49], %57 {strides = array<i32>} : memref<6x4x128xf32, #tpu.memory_space<vmem>>, vector<6x4x128xf32>,
    } else {
    }
    %c0 = arith.constant 0 : index
    %c0_1 = arith.constant 0 : index
    %c0_2 = arith.constant 0 : index
    %c0_3 = arith.constant 0 : index
    %3 = vector.load %arg2[%c0, %c0_1, %c0_2, %c0_3] : memref<1x4x2x128xf32, #tpu.memory_space<vmem>>, vector<1x4x2x128xf32>
    %4 = vector.shape_cast %3 : vector<1x4x2x128xf32> to vector<4x2x128xf32>
    %c0_4 = arith.constant 0 : index
    %c0_5 = arith.constant 0 : index
    %c0_6 = arith.constant 0 : index
    %c0_7 = arith.constant 0 : index
    %5 = vector.load %arg3[%c0_4, %c0_5, %c0_6, %c0_7] : memref<1x4x2x128xf32, #tpu.memory_space<vmem>>, vector<1x4x2x128xf32>
    %6 = vector.shape_cast %5 : vector<1x4x2x128xf32> to vector<4x2x128xf32>
    %7 = arith.subf %4, %6 : vector<4x2x128xf32>
    %c0_8 = arith.constant 0 : index
    %c0_9 = arith.constant 0 : index
    %c0_10 = arith.constant 0 : index
    %8 = vector.load %arg5[%c0_8, %c0_9, %c0_10] : memref<6x4x128xf32, #tpu.memory_space<vmem>>, vector<1x4x128xf32>
    %9 = vector.shape_cast %8 : vector<1x4x128xf32> to vector<4x128xf32>
    %cst = arith.constant dense<0.000000e+00> : vector<4x128xf32>
    %10 = vector.multi_reduction <add>, %4, %cst [1] : vector<4x2x128xf32> to vector<4x128xf32>
    %11 = arith.addf %9, %10 : vector<4x128xf32>
    %c0_11 = arith.constant 0 : index
    %c0_12 = arith.constant 0 : index
    %c0_13 = arith.constant 0 : index
    %12 = vector.load %arg5[%c0_11, %c0_12, %c0_13] : memref<6x4x128xf32, #tpu.memory_space<vmem>>, vector<1x4x128xf32>
    %13 = vector.shape_cast %12 : vector<1x4x128xf32> to vector<4x128xf32>
    %14 = vector.shape_cast %11 : vector<4x128xf32> to vector<1x4x128xf32>
    tpu.vector_store %arg5[%c0_11, %c0_12, %c0_13], %14 {strides = array<i32>} : memref<6x4x128xf32, #tpu.memory_space<vmem>>, vector<1x4x128xf32>,
    %c1 = arith.constant 1 : index
    %c0_14 = arith.constant 0 : index
    %c0_15 = arith.constant 0 : index
    %15 = vector.load %arg5[%c1, %c0_14, %c0_15] : memref<6x4x128xf32, #tpu.memory_space<vmem>>, vector<1x4x128xf32>
    %16 = vector.shape_cast %15 : vector<1x4x128xf32> to vector<4x128xf32>
    %cst_16 = arith.constant dense<0.000000e+00> : vector<4x128xf32>
    %17 = vector.multi_reduction <add>, %6, %cst_16 [1] : vector<4x2x128xf32> to vector<4x128xf32>
    %18 = arith.addf %16, %17 : vector<4x128xf32>
    %c1_17 = arith.constant 1 : index
    %c0_18 = arith.constant 0 : index
    %c0_19 = arith.constant 0 : index
    %19 = vector.load %arg5[%c1_17, %c0_18, %c0_19] : memref<6x4x128xf32, #tpu.memory_space<vmem>>, vector<1x4x128xf32>
    %20 = vector.shape_cast %19 : vector<1x4x128xf32> to vector<4x128xf32>
    %21 = vector.shape_cast %18 : vector<4x128xf32> to vector<1x4x128xf32>
    tpu.vector_store %arg5[%c1_17, %c0_18, %c0_19], %21 {strides = array<i32>} : memref<6x4x128xf32, #tpu.memory_space<vmem>>, vector<1x4x128xf32>,
    %c2 = arith.constant 2 : index
    %c0_20 = arith.constant 0 : index
    %c0_21 = arith.constant 0 : index
    %22 = vector.load %arg5[%c2, %c0_20, %c0_21] : memref<6x4x128xf32, #tpu.memory_space<vmem>>, vector<1x4x128xf32>
    %23 = vector.shape_cast %22 : vector<1x4x128xf32> to vector<4x128xf32>
    %24 = arith.mulf %4, %4 : vector<4x2x128xf32>
    %cst_22 = arith.constant dense<0.000000e+00> : vector<4x128xf32>
    %25 = vector.multi_reduction <add>, %24, %cst_22 [1] : vector<4x2x128xf32> to vector<4x128xf32>
    %26 = arith.addf %23, %25 : vector<4x128xf32>
    %c2_23 = arith.constant 2 : index
    %c0_24 = arith.constant 0 : index
    %c0_25 = arith.constant 0 : index
    %27 = vector.load %arg5[%c2_23, %c0_24, %c0_25] : memref<6x4x128xf32, #tpu.memory_space<vmem>>, vector<1x4x128xf32>
    %28 = vector.shape_cast %27 : vector<1x4x128xf32> to vector<4x128xf32>
    %29 = vector.shape_cast %26 : vector<4x128xf32> to vector<1x4x128xf32>
    tpu.vector_store %arg5[%c2_23, %c0_24, %c0_25], %29 {strides = array<i32>} : memref<6x4x128xf32, #tpu.memory_space<vmem>>, vector<1x4x128xf32>,
    %c3 = arith.constant 3 : index
    %c0_26 = arith.constant 0 : index
    %c0_27 = arith.constant 0 : index
    %30 = vector.load %arg5[%c3, %c0_26, %c0_27] : memref<6x4x128xf32, #tpu.memory_space<vmem>>, vector<1x4x128xf32>
    %31 = vector.shape_cast %30 : vector<1x4x128xf32> to vector<4x128xf32>
    %32 = arith.mulf %6, %6 : vector<4x2x128xf32>
    %cst_28 = arith.constant dense<0.000000e+00> : vector<4x128xf32>
    %33 = vector.multi_reduction <add>, %32, %cst_28 [1] : vector<4x2x128xf32> to vector<4x128xf32>
    %34 = arith.addf %31, %33 : vector<4x128xf32>
    %c3_29 = arith.constant 3 : index
    %c0_30 = arith.constant 0 : index
    %c0_31 = arith.constant 0 : index
    %35 = vector.load %arg5[%c3_29, %c0_30, %c0_31] : memref<6x4x128xf32, #tpu.memory_space<vmem>>, vector<1x4x128xf32>
    %36 = vector.shape_cast %35 : vector<1x4x128xf32> to vector<4x128xf32>
    %37 = vector.shape_cast %34 : vector<4x128xf32> to vector<1x4x128xf32>
    tpu.vector_store %arg5[%c3_29, %c0_30, %c0_31], %37 {strides = array<i32>} : memref<6x4x128xf32, #tpu.memory_space<vmem>>, vector<1x4x128xf32>,
    %c4 = arith.constant 4 : index
    %c0_32 = arith.constant 0 : index
    %c0_33 = arith.constant 0 : index
    %38 = vector.load %arg5[%c4, %c0_32, %c0_33] : memref<6x4x128xf32, #tpu.memory_space<vmem>>, vector<1x4x128xf32>
    %39 = vector.shape_cast %38 : vector<1x4x128xf32> to vector<4x128xf32>
    %40 = arith.mulf %4, %6 : vector<4x2x128xf32>
    %cst_34 = arith.constant dense<0.000000e+00> : vector<4x128xf32>
    %41 = vector.multi_reduction <add>, %40, %cst_34 [1] : vector<4x2x128xf32> to vector<4x128xf32>
    %42 = arith.addf %39, %41 : vector<4x128xf32>
    %c4_35 = arith.constant 4 : index
    %c0_36 = arith.constant 0 : index
    %c0_37 = arith.constant 0 : index
    %43 = vector.load %arg5[%c4_35, %c0_36, %c0_37] : memref<6x4x128xf32, #tpu.memory_space<vmem>>, vector<1x4x128xf32>
    %44 = vector.shape_cast %43 : vector<1x4x128xf32> to vector<4x128xf32>
    %45 = vector.shape_cast %42 : vector<4x128xf32> to vector<1x4x128xf32>
    tpu.vector_store %arg5[%c4_35, %c0_36, %c0_37], %45 {strides = array<i32>} : memref<6x4x128xf32, #tpu.memory_space<vmem>>, vector<1x4x128xf32>,
    %c5 = arith.constant 5 : index
    %c0_38 = arith.constant 0 : index
    %c0_39 = arith.constant 0 : index
    %46 = vector.load %arg5[%c5, %c0_38, %c0_39] : memref<6x4x128xf32, #tpu.memory_space<vmem>>, vector<1x4x128xf32>
    %47 = vector.shape_cast %46 : vector<1x4x128xf32> to vector<4x128xf32>
    %48 = arith.mulf %7, %7 : vector<4x2x128xf32>
    %cst_40 = arith.constant dense<0.000000e+00> : vector<4x128xf32>
    %49 = vector.multi_reduction <add>, %48, %cst_40 [1] : vector<4x2x128xf32> to vector<4x128xf32>
    %50 = arith.addf %47, %49 : vector<4x128xf32>
    %c5_41 = arith.constant 5 : index
    %c0_42 = arith.constant 0 : index
    %c0_43 = arith.constant 0 : index
    %51 = vector.load %arg5[%c5_41, %c0_42, %c0_43] : memref<6x4x128xf32, #tpu.memory_space<vmem>>, vector<1x4x128xf32>
    %52 = vector.shape_cast %51 : vector<1x4x128xf32> to vector<4x128xf32>
    %53 = vector.shape_cast %50 : vector<4x128xf32> to vector<1x4x128xf32>
    tpu.vector_store %arg5[%c5_41, %c0_42, %c0_43], %53 {strides = array<i32>} : memref<6x4x128xf32, #tpu.memory_space<vmem>>, vector<1x4x128xf32>,
    %c0_i32_44 = arith.constant 0 : i32
    %54 = arith.cmpi eq, %arg1, %c0_i32_44 : i32
    %55 = arith.extui %54 : i1 to i32
    %c0_i32_45 = arith.constant 0 : i32
    %56 = arith.cmpi ne, %55, %c0_i32_45 : i32
    scf.if %56 {
      %c0_46 = arith.constant 0 : index
      %c0_47 = arith.constant 0 : index
      %c0_48 = arith.constant 0 : index
      %57 = vector.load %arg5[%c0_46, %c0_47, %c0_48] : memref<6x4x128xf32, #tpu.memory_space<vmem>>, vector<1x4x128xf32>
      %58 = vector.shape_cast %57 : vector<1x4x128xf32> to vector<4x128xf32>
      %cst_49 = arith.constant dense<0.000000e+00> : vector<4xf32>
      %59 = vector.multi_reduction <add>, %58, %cst_49 [1] : vector<4x128xf32> to vector<4xf32>
      %60 = vector.shape_cast %59 : vector<4xf32> to vector<4x1xf32>
      %c1_50 = arith.constant 1 : index
      %c0_51 = arith.constant 0 : index
      %c0_52 = arith.constant 0 : index
      %61 = vector.load %arg5[%c1_50, %c0_51, %c0_52] : memref<6x4x128xf32, #tpu.memory_space<vmem>>, vector<1x4x128xf32>
      %62 = vector.shape_cast %61 : vector<1x4x128xf32> to vector<4x128xf32>
      %cst_53 = arith.constant dense<0.000000e+00> : vector<4xf32>
      %63 = vector.multi_reduction <add>, %62, %cst_53 [1] : vector<4x128xf32> to vector<4xf32>
      %64 = vector.shape_cast %63 : vector<4xf32> to vector<4x1xf32>
      %c2_54 = arith.constant 2 : index
      %c0_55 = arith.constant 0 : index
      %c0_56 = arith.constant 0 : index
      %65 = vector.load %arg5[%c2_54, %c0_55, %c0_56] : memref<6x4x128xf32, #tpu.memory_space<vmem>>, vector<1x4x128xf32>
      %66 = vector.shape_cast %65 : vector<1x4x128xf32> to vector<4x128xf32>
      %cst_57 = arith.constant dense<0.000000e+00> : vector<4xf32>
      %67 = vector.multi_reduction <add>, %66, %cst_57 [1] : vector<4x128xf32> to vector<4xf32>
      %68 = vector.shape_cast %67 : vector<4xf32> to vector<4x1xf32>
      %c3_58 = arith.constant 3 : index
      %c0_59 = arith.constant 0 : index
      %c0_60 = arith.constant 0 : index
      %69 = vector.load %arg5[%c3_58, %c0_59, %c0_60] : memref<6x4x128xf32, #tpu.memory_space<vmem>>, vector<1x4x128xf32>
      %70 = vector.shape_cast %69 : vector<1x4x128xf32> to vector<4x128xf32>
      %cst_61 = arith.constant dense<0.000000e+00> : vector<4xf32>
      %71 = vector.multi_reduction <add>, %70, %cst_61 [1] : vector<4x128xf32> to vector<4xf32>
      %72 = vector.shape_cast %71 : vector<4xf32> to vector<4x1xf32>
      %c4_62 = arith.constant 4 : index
      %c0_63 = arith.constant 0 : index
      %c0_64 = arith.constant 0 : index
      %73 = vector.load %arg5[%c4_62, %c0_63, %c0_64] : memref<6x4x128xf32, #tpu.memory_space<vmem>>, vector<1x4x128xf32>
      %74 = vector.shape_cast %73 : vector<1x4x128xf32> to vector<4x128xf32>
      %cst_65 = arith.constant dense<0.000000e+00> : vector<4xf32>
      %75 = vector.multi_reduction <add>, %74, %cst_65 [1] : vector<4x128xf32> to vector<4xf32>
      %76 = vector.shape_cast %75 : vector<4xf32> to vector<4x1xf32>
      %c5_66 = arith.constant 5 : index
      %c0_67 = arith.constant 0 : index
      %c0_68 = arith.constant 0 : index
      %77 = vector.load %arg5[%c5_66, %c0_67, %c0_68] : memref<6x4x128xf32, #tpu.memory_space<vmem>>, vector<1x4x128xf32>
      %78 = vector.shape_cast %77 : vector<1x4x128xf32> to vector<4x128xf32>
      %79 = vector.shape_cast %78 : vector<4x128xf32> to vector<1x4x128xf32>
      %cst_69 = arith.constant dense<0.000000e+00> : vector<1xf32>
      %80 = vector.multi_reduction <add>, %79, %cst_69 [1, 2] : vector<1x4x128xf32> to vector<1xf32>
      %81 = vector.shape_cast %80 : vector<1xf32> to vector<1x1x1xf32>
      %82 = vector.extract %81[0, 0, 0] : f32 from vector<1x1x1xf32>
      %cst_70 = arith.constant 3.906250e-03 : f32
      %83 = arith.mulf %82, %cst_70 : f32
      %cst_71 = arith.constant 2.500000e-01 : f32
      %84 = arith.mulf %83, %cst_71 : f32
      %cst_72 = arith.constant 9.99999996E-13 : f32
      %85 = arith.maximumf %84, %cst_72 : f32
      %cst_73 = arith.constant 1.000000e+00 : f32
      %86 = arith.divf %cst_73, %85 : f32
      %87 = math.log %86 : f32
      %cst_74 = arith.constant 4.34294462 : f32
      %88 = arith.mulf %cst_74, %87 : f32
      %cst_75 = arith.constant 0.000000e+00 : f32
      %89 = arith.cmpf ogt, %84, %cst_75 : f32
      %cst_76 = arith.constant 0x7F800000 : f32
      %90 = arith.select %89, %88, %cst_76 : f32
      %cst_77 = arith.constant 3.906250e-03 : f32
      %91 = vector.broadcast %cst_77 : f32 to vector<4x1xf32>
      %92 = arith.mulf %60, %91 : vector<4x1xf32>
      %cst_78 = arith.constant 3.906250e-03 : f32
      %93 = vector.broadcast %cst_78 : f32 to vector<4x1xf32>
      %94 = arith.mulf %64, %93 : vector<4x1xf32>
      %cst_79 = arith.constant 3.906250e-03 : f32
      %95 = vector.broadcast %cst_79 : f32 to vector<4x1xf32>
      %96 = arith.mulf %68, %95 : vector<4x1xf32>
      %97 = arith.mulf %92, %92 : vector<4x1xf32>
      %98 = arith.subf %96, %97 : vector<4x1xf32>
      %cst_80 = arith.constant 3.906250e-03 : f32
      %99 = vector.broadcast %cst_80 : f32 to vector<4x1xf32>
      %100 = arith.mulf %72, %99 : vector<4x1xf32>
      %101 = arith.mulf %94, %94 : vector<4x1xf32>
      %102 = arith.subf %100, %101 : vector<4x1xf32>
      %cst_81 = arith.constant 3.906250e-03 : f32
      %103 = vector.broadcast %cst_81 : f32 to vector<4x1xf32>
      %104 = arith.mulf %76, %103 : vector<4x1xf32>
      %105 = arith.mulf %92, %94 : vector<4x1xf32>
      %106 = arith.subf %104, %105 : vector<4x1xf32>
      %cst_82 = arith.constant 2.000000e+00 : f32
      %107 = vector.broadcast %cst_82 : f32 to vector<4x1xf32>
      %108 = arith.mulf %107, %92 : vector<4x1xf32>
      %109 = arith.mulf %108, %94 : vector<4x1xf32>
      %cst_83 = arith.constant 9.99999974E-5 : f32
      %110 = vector.broadcast %cst_83 : f32 to vector<4x1xf32>
      %111 = arith.addf %109, %110 : vector<4x1xf32>
      %cst_84 = arith.constant 2.000000e+00 : f32
      %112 = vector.broadcast %cst_84 : f32 to vector<4x1xf32>
      %113 = arith.mulf %112, %106 : vector<4x1xf32>
      %cst_85 = arith.constant 8.99999984E-4 : f32
      %114 = vector.broadcast %cst_85 : f32 to vector<4x1xf32>
      %115 = arith.addf %113, %114 : vector<4x1xf32>
      %116 = arith.mulf %111, %115 : vector<4x1xf32>
      %117 = arith.mulf %92, %92 : vector<4x1xf32>
      %118 = arith.mulf %94, %94 : vector<4x1xf32>
      %119 = arith.addf %117, %118 : vector<4x1xf32>
      %cst_86 = arith.constant 9.99999974E-5 : f32
      %120 = vector.broadcast %cst_86 : f32 to vector<4x1xf32>
      %121 = arith.addf %119, %120 : vector<4x1xf32>
      %122 = arith.addf %98, %102 : vector<4x1xf32>
      %cst_87 = arith.constant 8.99999984E-4 : f32
      %123 = vector.broadcast %cst_87 : f32 to vector<4x1xf32>
      %124 = arith.addf %122, %123 : vector<4x1xf32>
      %125 = arith.mulf %121, %124 : vector<4x1xf32>
      %126 = arith.divf %116, %125 : vector<4x1xf32>
      %127 = vector.shape_cast %126 : vector<4x1xf32> to vector<1x4x1xf32>
      %cst_88 = arith.constant dense<0.000000e+00> : vector<1xf32>
      %128 = vector.multi_reduction <add>, %127, %cst_88 [1, 2] : vector<1x4x1xf32> to vector<1xf32>
      %129 = vector.shape_cast %128 : vector<1xf32> to vector<1x1x1xf32>
      %130 = vector.extract %129[0, 0, 0] : f32 from vector<1x1x1xf32>
      %cst_89 = arith.constant 2.500000e-01 : f32
      %131 = arith.mulf %130, %cst_89 : f32
      %132 = tpu.iota {dimensions = array<i32: 0>} : vector<2x128xi32>
      %c0_i32_90 = arith.constant 0 : i32
      %133 = vector.broadcast %c0_i32_90 : i32 to vector<2x128xi32>
      %134 = arith.cmpi eq, %132, %133 : vector<2x128xi32>
      %135 = vector.broadcast %90 : f32 to vector<2x128xf32>
      %136 = vector.broadcast %131 : f32 to vector<2x128xf32>
      %137 = arith.select %134, %135, %136 : vector<2x128xi1>, vector<2x128xf32>
      %c0_91 = arith.constant 0 : index
      %c0_92 = arith.constant 0 : index
      %c0_93 = arith.constant 0 : index
      %138 = vector.load %arg4[%c0_91, %c0_92, %c0_93] : memref<1x2x128xf32, #tpu.memory_space<vmem>>, vector<1x2x128xf32>
      %139 = vector.shape_cast %138 : vector<1x2x128xf32> to vector<2x128xf32>
      %140 = vector.shape_cast %137 : vector<2x128xf32> to vector<1x2x128xf32>
      tpu.vector_store %arg4[%c0_91, %c0_92, %c0_93], %140 {strides = array<i32>} : memref<1x2x128xf32, #tpu.memory_space<vmem>>, vector<1x2x128xf32>,
    } else {
    }
    return
  }
  func.func @transform_0(%arg0: i32, %arg1: i32) -> (i32, i32, i32, i32) {
    %c0_i32 = arith.constant 0 : i32
    %c0_i32_0 = arith.constant 0 : i32
    %c0_i32_1 = arith.constant 0 : i32
    return %arg0, %c0_i32, %arg1, %c0_i32_0 : i32, i32, i32, i32
  }
  func.func @transform_1(%arg0: i32, %arg1: i32) -> (i32, i32, i32, i32) {
    %c0_i32 = arith.constant 0 : i32
    %c0_i32_0 = arith.constant 0 : i32
    %c0_i32_1 = arith.constant 0 : i32
    return %arg0, %c0_i32, %arg1, %c0_i32_0 : i32, i32, i32, i32
  }
  func.func @transform_2(%arg0: i32, %arg1: i32) -> (i32, i32, i32) {
    %c0_i32 = arith.constant 0 : i32
    %c0_i32_0 = arith.constant 0 : i32
    %c0_i32_1 = arith.constant 0 : i32
    return %arg0, %c0_i32, %c0_i32_0 : i32, i32, i32
  }
}

</mosaic_0001>

<bundles_post_ra>
// kernel: tpu_custom_call.1
= control target key start
LH: loop header
LB: loop body
LE: loop exit
PB: predicated region body
PF: predicated region fallthrough
CT: control target
= control target key end

     0   :  { %7 = vsyncpa [#allocation4], 0  ;;  %s1270_s0 = inlined_call_operand.hbm [shape: f32[2,4,2,128], index: 0, kind: input, shape index: {}]   ;;  %s1271_s1 = inlined_call_operand.hbm [shape: f32[2,4,2,128], index: 1, kind: input, shape index: {}]   ;;  %s1272_s2 = inlined_call_operand.hbm [shape: f32[2,2,128], index: 2, kind: output, shape index: {}]  }
   0x1   :  { %9 = vsyncpa [#allocation4 + $0x1], 0 }
   0x2   :  { %10 = vsyncpa [#allocation7], 0 }
   0x3   :  { %12 = vsyncpa [#allocation7 + $0x1], 0 }
   0x4   :  { %13 = vsyncpa [#allocation5], 0 }
   0x5   :  { %15 = vsyncpa [#allocation5 + $0x1], 0  ;;  %s980_s9 = smov 0   ;;  %s982_s10 = smov 0  }
   0x6   :  { %s984_s11 = smov 0   ;;  %s986_s12 = smov 0  }
   0x7   :  { %s988_s13 = smov 0   ;;  %s990_s14 = smov 0  }
   0x8 LB: > { %s711_s15 = sadd.s32 4294967295, %s956_s14   ;;  %s712_s16 = sadd.s32 4294967294, %s956_s14   ;;  %s956_s14 = sphi %s990_s14, %s21_s14   ;;  %s952_s13 = sphi %s988_s13, %s1283_s13   ;;  %s948_s12 = sphi %s986_s12, %s1282_s12   ;;  %s944_s11 = sphi %s984_s11, %s1281_s11   ;;  %s940_s10 = sphi %s982_s10, %s1280_s10   ;;  %s936_s9 = sphi %s980_s9, %s1279_s9  }
   0x9   : > { %s33_s17 = sadd.s32 1, %s952_s13  ;;  %s42_s18 = sadd.s32 1, %s944_s11 }
   0xa   : > { %p35_p0 = scmp.ge.s32.totalorder %s33_s17, 2  ;;  %p49_p1 = scmp.ne.s32.totalorder %s944_s11, %s940_s10 }
   0xb   : > { %p50_p2 = scmp.eq.s32.totalorder %s956_s14, 0  ;;  %p55_p3 = scmp.ne.s32.totalorder %s940_s10, %s936_s9 }
   0xc   : > { %s1285_s17 = smov (%p35_p0, %s33_s17), 0  ;;  %p56_p5 = scmp.eq.s32.totalorder %s711_s15, 0 }
   0xd   : > { %p1021_p4 = por %p50_p2, %p49_p1  ;;  %s37_s20 = ssub.s32 %s952_s13, %s1285_s17 }
   0xe   : > { %p107_p6 = scmp.eq.s32.totalorder %s711_s15, 1  ;;  %p40_p7 = scmp.eq.s32.totalorder %s37_s20, 0 }
   0xf   : > { %p1027_p8 = por %p56_p5, %p55_p3  ;;  %p113_p10 = scmp.eq.s32.totalorder %s712_s16, 1 }
  0x10   : > { %p1031_p9 = por %p107_p6, %p49_p1  ;;  %p714_p12 = scmp.ge.s32.totalorder %s956_s14, 2 }
  0x11   : > { %s1036_s23 = scalar_select %p40_p7, %s944_s11, %s42_s18  }
  0x12   : > { %p1038_p11 = por %p113_p10, %p55_p3  ;;  %p756_p13 = scmp.lt.s32.totalorder %s956_s14, 2 }
  0x13   : > { %s1045_s25 = sand.u32 1, %s944_s11   ;;  %s729_s27 = sshll.u32 %s952_s13, 7 }
  0x14   : > { %s715_s26 = sshll.u32 %s1045_s25, 3  ;;  %s144_s30 = scalar_lea.hbm %s1270_s0, %s729_s27 }
  0x15   : > { %s137_s3 = scalar_lea.vmem [#allocation3], %s715_s26  ;;  %p1058_p0 = pnand %p756_p13, %p1021_p4 }
  0x16   : > { %s145_s4 = sshll.u32 %s137_s3, 4  ;;  %p721_p1 = scmp.ge.s32.totalorder %s956_s14, 1  ;;  %s146_s4 = int_to_ptr.vmem [resolvable:$true] %s145_s4 }
  0x17   : > { %s134_s6 = scalar_lea.sflag [#allocation4], %s1045_s25  ;;  %p818_p2 = pneg %p1058_p0 }
  0x18   : > { %s829_s7 = scalar_lea.vmem %s146_s4, 128  ;;  %s958_s8 = smov [#allocation3]  }
  0x19   : > { %p830_p3 = scmp.ne.s32.totalorder %s146_s4, %s829_s7  ;;  %s834_s15 = sshll.u32 %s958_s8, 4  ;;  %s835_s15 = int_to_ptr.vmem [resolvable:$false] %s834_s15 }
  0x1a   : > { %s836_s16 = scalar_lea.vmem %s835_s15, 256  ;;  %p837_p4 = scmp.lt.s32.totalorder %s146_s4, %s835_s15 }
  0x1b   : > { %p832_p5 = pnand %p830_p3, %p818_p2  ;;  %p838_p7 = scmp.lt.s32.totalorder %s836_s16, %s829_s7 }
  0x1d   : > { %p833_p6 = pneg %p832_p5  ;;  %p839_p10 = por %p838_p7, %p837_p4 }
  0x1f   : > { %p840_p13 = pnand %p839_p10, %p833_p6 }
  0x21   : > { %843 = shalt.err (!%p840_p13)
}
  0x22   : > { %s959_s18 = smov 32   ;;  %s960_s19 = smov 2  }
  0x23   : > { %748 = dma.hbm_to_vmem [thread:$0]  (!%p1058_p0), %s144_s30, 128, %s146_s4, %s134_s6, %s959_s18, %s959_s18, %s960_s19  }
  0x24   : > { %p175_p3 = scmp.lt.s32.totalorder %s956_s14, 3  ;;  %s166_s29 = scalar_lea.hbm %s1271_s1, %s729_s27 }
  0x25   : > { %s159_s7 = scalar_lea.vmem [#allocation6], %s715_s26  ;;  %s156_s15 = scalar_lea.sflag [#allocation7], %s1045_s25 }
  0x26   : > { %p1079_p5 = pnand %p721_p1, %p175_p3  ;;  %s167_s8 = sshll.u32 %s159_s7, 4  ;;  %s168_s8 = int_to_ptr.vmem [resolvable:$true] %s167_s8 }
  0x27   : > { %s857_s16 = scalar_lea.vmem %s168_s8, 128  ;;  %s961_s30 = smov [#allocation6]  }
  0x28   : > { %p858_p6 = scmp.ne.s32.totalorder %s168_s8, %s857_s16  ;;  %s862_s4 = sshll.u32 %s961_s30, 4  ;;  %s863_s4 = int_to_ptr.vmem [resolvable:$false] %s862_s4 }
  0x29   : > { %s864_s27 = scalar_lea.vmem %s863_s4, 256  ;;  %p865_p10 = scmp.lt.s32.totalorder %s168_s8, %s863_s4 }
  0x2a   : > { %p860_p4 = pnand %p858_p6, %p818_p2  ;;  %p866_p1 = scmp.lt.s32.totalorder %s864_s27, %s857_s16 }
  0x2c   : > { %p861_p7 = pneg %p860_p4  ;;  %p867_p13 = por %p866_p1, %p865_p10 }
  0x2e   : > { %p868_p3 = pnand %p867_p13, %p861_p7 }
  0x30   : > { %871 = shalt.err (!%p868_p3)
}
  0x31   : > { %751 = dma.hbm_to_vmem [thread:$0]  (!%p1058_p0), %s166_s29, 128, %s168_s8, %s156_s15, %s959_s18, %s959_s18, %s960_s19  }
  0x32   : > { %179 = sbr.rel (%p1079_p5) target bundleno = 516 (0x204), region = 28  ;;  %s1094_s25 = sand.u32 (!%p1079_p5), 1, %s940_s10  }
  0x33   : > { %s722_s26 = sshll.u32 (!%p1079_p5), %s1094_s25, 3  ;;  %s182_s6 = scalar_lea.sflag (!%p1079_p5), [#allocation4], %s1094_s25 }
  0x34   : > { %s1098_s20 = scalar_lea.vmem (!%p1079_p5), [#allocation3], %s722_s26 }
  0x37   : > { %923 = dma.done.wait (%p1027_p8), %s182_s6, 128  }
  0x38   : > { %925 = vsyncadd (%p1027_p8), %s182_s6, 4294967168  ;;  %s191_s5 = scalar_lea.sflag [#allocation7], %s1094_s25  ;;  %s194_s18 = scalar_lea.vmem [#allocation6], %s722_s26 }
  0x39   : > { %927 = dma.done.wait (%p1027_p8), %s191_s5, 128  }
  0x3a   : > { %929 = vsyncadd (%p1027_p8), %s191_s5, 4294967168  ;;  %v962_v0 = vmov 0.0   ;;  %vm243_vm0 = vcmask 1041408   ;;  %v1109_v1 = vld [vmem:[%s194_s18] sm:$0x3]  ;;  %vm276_vm1 = vcmask 1041409  }
  0x3b   : > { %225 = vst [vmem:[#allocation2 + $0x4] sm:$0xf] %v962_v0  ;;  %224 = vst [vmem:[#allocation2] sm:$0xf] %v962_v0  ;;  %v1111_v2 = vld [vmem:[%s194_s18 + $0x2] sm:$0x3]  ;;  %v1123_v7 = vmul.f32 %v1109_v1, %v1109_v1 }
  0x3c   : > { %226 = vst [vmem:[#allocation2 + $0x8] sm:$0xf] %v962_v0  ;;  %227 = vst [vmem:[#allocation2 + $0xc] sm:$0xf] %v962_v0  ;;  %v1113_v3 = vld [vmem:[%s194_s18 + $0x4] sm:$0x3]  ;;  %v1127_v8 = vmul.f32 %v1111_v2, %v1111_v2 }
  0x3d   : > { %228 = vst [vmem:[#allocation2 + $0x10] sm:$0xf] %v962_v0  ;;  %229 = vst [vmem:[#allocation2 + $0x14] sm:$0xf] %v962_v0  ;;  %v1115_v4 = vld [vmem:[%s194_s18 + $0x6] sm:$0x3] }
  0x3e   : > { %v287_v5 = vsel %vm243_vm0, %v1109_v1, 0.0  ;;  %v294_v6 = vsel %vm243_vm0, %v1111_v2, 0.0  ;;  %v301_v11 = vsel %vm243_vm0, %v1113_v3, 0.0  ;;  %v308_v12 = vsel %vm243_vm0, %v1115_v4, 0.0  ;;  %v1134_v13 = vld [vmem:[%s1098_s20] sm:$0x3] }
  0x3f   : > { %v288_v9 = vrot.slane %v287_v5, 4  ;;  %v295_v10 = vrot.slane %v294_v6, 4  ;;  %v302_v14 = vrot.slane %v301_v11, 4  ;;  %v309_v15 = vrot.slane %v308_v12, 4  ;;  %v1137_v16 = vld [vmem:[%s1098_s20 + $0x2] sm:$0x3] }
  0x40   : > { %v1140_v17 = vld [vmem:[%s1098_s20 + $0x4] sm:$0x3]  ;;  %v238_v18 = vsub.f32 %v1134_v13, %v1109_v1  ;;  %v327_v19 = vmul.f32 %v1134_v13, %v1134_v13  ;;  %vm278_vm2 = vcmask 1042434   ;;  %v1147_v22 = vld [vmem:[%s1098_s20 + $0x6] sm:$0x3]  ;;  %v239_v23 = vsub.f32 %v1137_v16, %v1111_v2  ;;  %s724_s15 = sshll.u32 %s1094_s25, 1 }
  0x41   : > { %v289_v20 = vadd.f32 %v288_v9, %v287_v5  ;;  %v296_v21 = vadd.f32 %v295_v10, %v294_v6  ;;  %v240_v24 = vsub.f32 %v1140_v17, %v1113_v3  ;;  %vm280_vm3 = vcmask 1043459   ;;  %s963_s29 = smov 1e-12   ;;  %s726_s30 = sshll.u32 %s948_s12, 5 }
  0x42   : > { %v303_v25 = vadd.f32 %v302_v14, %v301_v11  ;;  %v310_v26 = vadd.f32 %v309_v15, %v308_v12  ;;  %v241_v27 = vsub.f32 %v1147_v22, %v1115_v4  ;;  %v459_v28 = vmul.f32 %v238_v18, %v238_v18  ;;  %v286_v61 = vld [vmem:[#allocation2 + $0x4] sm:$0xf]  ;;  %s219_s27 = scalar_lea.vmem [#allocation8], %s724_s15  ;;  %s1228_s18 = scalar_lea.hbm %s1272_s2, %s726_s30 }
  0x43   : > { %v290_v29 = vrot.slane %v289_v20, 2  ;;  %v297_v30 = vrot.slane %v296_v21, 2  ;;  %v460_v31 = vmul.f32 %v239_v23, %v239_v23  ;;  %v461_v32 = vmul.f32 %v240_v24, %v240_v24  ;;  %s606_s26 = sshll.u32 %s219_s27, 4  ;;  %s964_s12 = smov [#allocation8]   ;;  %s607_s26 = int_to_ptr.vmem [resolvable:$true] %s606_s26 }
  0x44   : > { %v304_v33 = vrot.slane %v303_v25, 2  ;;  %v311_v34 = vrot.slane %v310_v26, 2  ;;  %v462_v35 = vmul.f32 %v241_v27, %v241_v27  ;;  %v463_v36 = vsel %vm243_vm0, %v459_v28, 0.0 }
  0x45   : > { %v291_v37 = vadd.f32 %v290_v29, %v289_v20  ;;  %v298_v38 = vadd.f32 %v297_v30, %v296_v21  ;;  %v464_v39 = vrot.slane %v463_v36, 4  ;;  %v470_v40 = vsel %vm243_vm0, %v460_v31, 0.0 }
  0x46   : > { %v305_v41 = vadd.f32 %v304_v33, %v303_v25  ;;  %v312_v42 = vadd.f32 %v311_v34, %v310_v26  ;;  %v471_v43 = vrot.slane %v470_v40, 4  ;;  %v477_v44 = vsel %vm243_vm0, %v461_v32, 0.0 }
  0x47   : > { %v292_v45 = vrot.slane %v291_v37, 1  ;;  %v299_v46 = vrot.slane %v298_v38, 1  ;;  %v465_v47 = vadd.f32 %v464_v39, %v463_v36  ;;  %v478_v48 = vrot.slane %v477_v44, 4 }
  0x48   : > { %v306_v49 = vrot.slane %v305_v41, 1  ;;  %v313_v50 = vrot.slane %v312_v42, 1  ;;  %v472_v51 = vadd.f32 %v471_v43, %v470_v40  ;;  %v484_v52 = vsel %vm243_vm0, %v462_v35, 0.0 }
  0x49   : > { %v293_v53 = vadd.f32 %v292_v45, %v291_v37  ;;  %v300_v54 = vadd.f32 %v299_v46, %v298_v38  ;;  %v466_v55 = vrot.slane %v465_v47, 2  ;;  %v479_v56 = vadd.f32 %v478_v48, %v477_v44  ;;  %v458_v44 = vld [vmem:[#allocation2 + $0x14] sm:$0xf] }
  0x4a   : > { %v307_v57 = vadd.f32 %v306_v49, %v305_v41  ;;  %v314_v58 = vadd.f32 %v313_v50, %v312_v42  ;;  %v473_v59 = vrot.slane %v472_v51, 2  ;;  %v485_v60 = vrot.slane %v484_v52, 4 }
  0x4b   : > { %v319_v62 = vsel %vm276_vm1, %v300_v54, %v293_v53  ;;  %v467_v63 = vadd.f32 %v466_v55, %v465_v47  ;;  %v480_v0 = vrot.slane %v479_v56, 2  ;;  %v328_v5 = vmul.f32 %v1137_v16, %v1137_v16 }
  0x4c   : > { %v320_v6 = vsel %vm278_vm2, %v307_v57, %v319_v62  ;;  %v474_v9 = vadd.f32 %v473_v59, %v472_v51  ;;  %v486_v10 = vadd.f32 %v485_v60, %v484_v52  ;;  %v329_v11 = vmul.f32 %v1140_v17, %v1140_v17 }
  0x4d   : > { %v321_v12 = vsel %vm280_vm3, %v314_v58, %v320_v6  ;;  %vm505_vm4 = vcmask 1043456   ;;  %v468_v14 = vrot.slane %v467_v63, 1  ;;  %v481_v15 = vadd.f32 %v480_v0, %v479_v56 }
  0x4e   : > { %v330_v18 = vmul.f32 %v1147_v22, %v1147_v22  ;;  %v323_v20 = vadd.f32 %v321_v12, %v286_v61  ;;  %v475_v21 = vrot.slane %v474_v9, 1  ;;  %v487_v23 = vrot.slane %v486_v10, 2 }
  0x4f   : > { %v331_v24 = vsel %vm243_vm0, %v327_v19, 0.0  ;;  %v469_v25 = vadd.f32 %v468_v14, %v467_v63  ;;  %v482_v26 = vrot.slane %v481_v15, 1  ;;  %v338_v28 = vsel %vm243_vm0, %v328_v5, 0.0 }
  0x50   : > { %v332_v27 = vrot.slane %v331_v24, 4  ;;  %324 = vst [vmem:[#allocation2 + $0x4] sm:$0xf] %v323_v20  ;;  %v476_v29 = vadd.f32 %v475_v21, %v474_v9  ;;  %v488_v30 = vadd.f32 %v487_v23, %v486_v10  ;;  %v339_v31 = vrot.slane %v338_v28, 4 }
  0x51   : > { %v345_v32 = vsel %vm243_vm0, %v329_v11, 0.0  ;;  %v483_v33 = vadd.f32 %v482_v26, %v481_v15  ;;  %v352_v36 = vsel %vm243_vm0, %v330_v18, 0.0  ;;  %v244_v43 = vsel %vm243_vm0, %v1134_v13, 0.0 }
  0x52   : > { %v333_v34 = vadd.f32 %v332_v27, %v331_v24  ;;  %v346_v35 = vrot.slane %v345_v32, 4  ;;  %v489_v37 = vrot.slane %v488_v30, 1  ;;  %v495_v38 = vsel %vm276_vm1, %v476_v29, %v469_v25  ;;  %v326_v25 = vld [vmem:[#allocation2 + $0x8] sm:$0xf] }
  0x53   : > { %v340_v19 = vadd.f32 %v339_v31, %v338_v28  ;;  %v353_v39 = vrot.slane %v352_v36, 4  ;;  %v496_v40 = vsel %vm278_vm2, %v483_v33, %v495_v38  ;;  %v245_v48 = vrot.slane %v244_v43, 4 }
  0x54   : > { %v334_v41 = vrot.slane %v333_v34, 2  ;;  %v347_v42 = vadd.f32 %v346_v35, %v345_v32  ;;  %v490_v45 = vadd.f32 %v489_v37, %v488_v30  ;;  %v251_v51 = vsel %vm243_vm0, %v1137_v16, 0.0 }
  0x55   : > { %v341_v46 = vrot.slane %v340_v19, 2  ;;  %v354_v47 = vadd.f32 %v353_v39, %v352_v36  ;;  %v258_v52 = vsel %vm243_vm0, %v1140_v17, 0.0  ;;  %v246_v56 = vadd.f32 %v245_v48, %v244_v43 }
  0x56   : > { %v335_v49 = vadd.f32 %v334_v41, %v333_v34  ;;  %v348_v50 = vrot.slane %v347_v42, 2  ;;  %v497_v53 = vsel %vm280_vm3, %v490_v45, %v496_v40  ;;  %v252_v61 = vrot.slane %v251_v51, 4 }
  0x57   : > { %v342_v54 = vadd.f32 %v341_v46, %v340_v19  ;;  %v355_v55 = vrot.slane %v354_v47, 2  ;;  %v509_v57 = vld [vmem:[#allocation2 + $0x4] sm:$0xf]  ;;  %v499_v58 = vadd.f32 %v497_v53, %v458_v44  ;;  %v247_v5 = vrot.slane %v246_v56, 2 }
  0x58   : > { %v336_v59 = vrot.slane %v335_v49, 1  ;;  %v349_v60 = vadd.f32 %v348_v50, %v347_v42  ;;  %v510_v62 = vsel %vm505_vm4, %v509_v57, 0.0  ;;  %v253_v10 = vadd.f32 %v252_v61, %v251_v51 }
  0x59   : > { %v343_v63 = vrot.slane %v342_v54, 1  ;;  %v356_v0 = vadd.f32 %v355_v55, %v354_v47  ;;  %511 = vadd.xlane.f32.xlu1 %v510_v62  ;;  %500 = vst [vmem:[#allocation2 + $0x14] sm:$0xf] %v499_v58  ;;  %v259_v11 = vrot.slane %v258_v52, 4  ;;  %v248_v15 = vadd.f32 %v247_v5, %v246_v56  ;;  %v242_v56 = vld [vmem:[#allocation2] sm:$0xf] }
  0x5a   : > { %v337_v6 = vadd.f32 %v336_v59, %v335_v49  ;;  %v350_v9 = vrot.slane %v349_v60, 1  ;;  %v265_v18 = vsel %vm243_vm0, %v1147_v22, 0.0  ;;  %v254_v21 = vrot.slane %v253_v10, 2 }
  0x5b   : > { %v344_v12 = vadd.f32 %v343_v63, %v342_v54  ;;  %v357_v14 = vrot.slane %v356_v0, 1  ;;  %v260_v23 = vadd.f32 %v259_v11, %v258_v52  ;;  %v266_v24 = vrot.slane %v265_v18, 4 }
  0x5c   : > { %v351_v20 = vadd.f32 %v350_v9, %v349_v60  ;;  %v249_v28 = vrot.slane %v248_v15, 1  ;;  %v415_v29 = vmul.f32 %v1109_v1, %v1134_v13  ;;  %v255_v31 = vadd.f32 %v254_v21, %v253_v10 }
  0x5d   : > { %v358_v26 = vadd.f32 %v357_v14, %v356_v0  ;;  %v363_v27 = vsel %vm276_vm1, %v344_v12, %v337_v6  ;;  %v261_v32 = vrot.slane %v260_v23, 2  ;;  %v267_v33 = vadd.f32 %v266_v24, %v265_v18 }
  0x5e   : > { %v364_v30 = vsel %vm278_vm2, %v351_v20, %v363_v27  ;;  %v250_v35 = vadd.f32 %v249_v28, %v248_v15  ;;  %v416_v36 = vmul.f32 %v1111_v2, %v1137_v16  ;;  %v417_v37 = vmul.f32 %v1113_v3, %v1140_v17 }
  0x5f   : > { %v365_v34 = vsel %vm280_vm3, %v358_v26, %v364_v30  ;;  %v256_v19 = vrot.slane %v255_v31, 1  ;;  %v262_v39 = vadd.f32 %v261_v32, %v260_v23  ;;  %v268_v40 = vrot.slane %v267_v33, 2 }
  0x60   : > { %v367_v38 = vadd.f32 %v365_v34, %v326_v25  ;;  %v525_v41 = vld [vmem:[#allocation2 + $0x14] sm:$0xf]  ;;  %v418_v1 = vmul.f32 %v1115_v4, %v1147_v22  ;;  %v419_v13 = vsel %vm243_vm0, %v415_v29, 0.0  ;;  %v426_v42 = vsel %vm243_vm0, %v416_v36, 0.0 }
  0x61   : > { %v433_v43 = vsel %vm243_vm0, %v417_v37, 0.0  ;;  %v526_v44 = vsel %vm505_vm4, %v525_v41, 0.0  ;;  %v257_v2 = vadd.f32 %v256_v19, %v255_v31  ;;  %v263_v16 = vrot.slane %v262_v39, 1  ;;  %v414_v37 = vld [vmem:[#allocation2 + $0x10] sm:$0xf] }
  0x62   : > { %368 = vst [vmem:[#allocation2 + $0x8] sm:$0xf] %v367_v38  ;;  %v269_v17 = vadd.f32 %v268_v40, %v267_v33  ;;  %527 = vadd.xlane.f32.xlu0 %v526_v44  ;;  %v420_v45 = vrot.slane %v419_v13, 4  ;;  %v427_v46 = vrot.slane %v426_v42, 4  ;;  %v434_v47 = vrot.slane %v433_v43, 4 }
  0x63   : > { %v440_v48 = vsel %vm243_vm0, %v418_v1, 0.0  ;;  %v264_v49 = vadd.f32 %v263_v16, %v262_v39  ;;  %v277_v50 = vsel %vm276_vm1, %v257_v2, %v250_v35  ;;  %v373_v55 = vmul.f32 %v1113_v3, %v1113_v3 }
  0x64   : > { %v270_v22 = vrot.slane %v269_v17, 1  ;;  %v441_v51 = vrot.slane %v440_v48, 4  ;;  %v421_v52 = vadd.f32 %v420_v45, %v419_v13  ;;  %v428_v53 = vadd.f32 %v427_v46, %v426_v42 }
  0x65   : > { %v435_v54 = vadd.f32 %v434_v47, %v433_v43  ;;  %v279_v58 = vsel %vm278_vm2, %v264_v49, %v277_v50  ;;  %v374_v60 = vmul.f32 %v1115_v4, %v1115_v4  ;;  %v375_v0 = vsel %vm243_vm0, %v1123_v7, 0.0 }
  0x66   : > { %v271_v57 = vadd.f32 %v270_v22, %v269_v17  ;;  %v442_v59 = vadd.f32 %v441_v51, %v440_v48  ;;  %v422_v61 = vrot.slane %v421_v52, 2  ;;  %v429_v62 = vrot.slane %v428_v53, 2 }
  0x67   : > { %v436_v63 = vrot.slane %v435_v54, 2  ;;  %v376_v9 = vrot.slane %v375_v0, 4  ;;  %v382_v3 = vsel %vm243_vm0, %v1127_v8, 0.0  ;;  %v389_v25 = vsel %vm243_vm0, %v373_v55, 0.0 }
  0x68   : > { %v281_v5 = vsel %vm280_vm3, %v271_v57, %v279_v58  ;;  %v443_v6 = vrot.slane %v442_v59, 2  ;;  %v423_v12 = vadd.f32 %v422_v61, %v421_v52  ;;  %v430_v14 = vadd.f32 %v429_v62, %v428_v53  ;;  %v370_v53 = vld [vmem:[#allocation2 + $0xc] sm:$0xf] }
  0x69   : > { %v513_v10 = vld [vmem:[#allocation2 + $0x8] sm:$0xf]  ;;  %v283_v11 = vadd.f32 %v281_v5, %v242_v56  ;;  %v437_v15 = vadd.f32 %v436_v63, %v435_v54  ;;  %v377_v20 = vadd.f32 %v376_v9, %v375_v0  ;;  %v383_v21 = vrot.slane %v382_v3, 4 }
  0x6a   : > { %v514_v4 = vsel %vm505_vm4, %v513_v10, 0.0  ;;  %v444_v18 = vadd.f32 %v443_v6, %v442_v59  ;;  %v424_v7 = vrot.slane %v423_v12, 1  ;;  %v431_v23 = vrot.slane %v430_v14, 1 }
  0x6b   : > { %515 = vadd.xlane.f32.xlu1 %v514_v4  ;;  %284 = vst [vmem:[#allocation2] sm:$0xf] %v283_v11  ;;  %v438_v24 = vrot.slane %v437_v15, 1  ;;  %v378_v27 = vrot.slane %v377_v20, 2  ;;  %v384_v8 = vadd.f32 %v383_v21, %v382_v3  ;;  %v390_v28 = vrot.slane %v389_v25, 4 }
  0x6c   : > { %v445_v26 = vrot.slane %v444_v18, 1  ;;  %v425_v29 = vadd.f32 %v424_v7, %v423_v12  ;;  %v432_v30 = vadd.f32 %v431_v23, %v430_v14  ;;  %v396_v32 = vsel %vm243_vm0, %v374_v60, 0.0 }
  0x6d   : > { %v439_v31 = vadd.f32 %v438_v24, %v437_v15  ;;  %v379_v34 = vadd.f32 %v378_v27, %v377_v20  ;;  %v385_v35 = vrot.slane %v384_v8, 2  ;;  %v391_v36 = vadd.f32 %v390_v28, %v389_v25 }
  0x6e   : > { %v446_v33 = vadd.f32 %v445_v26, %v444_v18  ;;  %v451_v38 = vsel %vm276_vm1, %v432_v30, %v425_v29  ;;  %v397_v19 = vrot.slane %v396_v32, 4  ;;  %vm573_vm5 = vcmask 3072  }
  0x6f   : > { %v452_v39 = vsel %vm278_vm2, %v439_v31, %v451_v38  ;;  %v380_v40 = vrot.slane %v379_v34, 1  ;;  %v386_v41 = vadd.f32 %v385_v35, %v384_v8  ;;  %v392_v1 = vrot.slane %v391_v36, 2 }
  0x70   : > { %v453_v13 = vsel %vm280_vm3, %v446_v33, %v452_v39  ;;  %v398_v42 = vadd.f32 %v397_v19, %v396_v32 }
  0x71   : > { %v455_v44 = vadd.f32 %v453_v13, %v414_v37  ;;  %v381_v2 = vadd.f32 %v380_v40, %v379_v34  ;;  %v387_v16 = vrot.slane %v386_v41, 1  ;;  %v393_v17 = vadd.f32 %v392_v1, %v391_v36 }
  0x72   : > { %v504_v43 = vld [vmem:[#allocation2] sm:$0xf]  ;;  %v399_v46 = vrot.slane %v398_v42, 2 }
  0x73   : > { %v506_v45 = vsel %vm505_vm4, %v504_v43, 0.0  ;;  %456 = vst [vmem:[#allocation2 + $0x10] sm:$0xf] %v455_v44  ;;  %v388_v47 = vadd.f32 %v387_v16, %v386_v41  ;;  %v394_v48 = vrot.slane %v393_v17, 1 }
  0x74   : > { %507 = vadd.xlane.f32.xlu0 %v506_v45  ;;  %v400_v49 = vadd.f32 %v399_v46, %v398_v42 }
  0x75   : > { %v395_v22 = vadd.f32 %v394_v48, %v393_v17  ;;  %v407_v50 = vsel %vm276_vm1, %v388_v47, %v381_v2  ;;  %v585_v47 = vlaneseq }
  0x76   : > { %v401_v51 = vrot.slane %v400_v49, 1 }
  0x77   : > { %v408_v52 = vsel %vm278_vm2, %v395_v22, %v407_v50  ;;  %v586_v48 = vshrl.u32 %v585_v47, 7 }
  0x78   : > { %v402_v54 = vadd.f32 %v401_v51, %v400_v49 }
  0x79   : > { %vm587_vm6 = vcmp.eq.s32.totalorder %v586_v48, 0 }
  0x7a   : > { %v521_v55 = vld [vmem:[#allocation2 + $0x10] sm:$0xf]  ;;  %v409_v56 = vsel %vm280_vm3, %v402_v54, %v408_v52 }
  0x7b   : > { %v522_v57 = vsel %vm505_vm4, %v521_v55, 0.0  ;;  %v411_v58 = vadd.f32 %v409_v56, %v370_v53 }
  0x7c   : > { %523 = vadd.xlane.f32.xlu1 %v522_v57 }
  0x7d   : > { %412 = vst [vmem:[#allocation2 + $0xc] sm:$0xf] %v411_v58 }
  0x84   : > { %v517_v59 = vld [vmem:[#allocation2 + $0xc] sm:$0xf] }
  0x85   : > { %v518_v60 = vsel %vm505_vm4, %v517_v59, 0.0 }
  0x86   : > { %519 = vadd.xlane.f32.xlu0 %v518_v60 }
  0xe2   : > { %v512_v3 = vpop.xlane.xlu1 %511 }
  0xe3   : > { %v550_v11 = vmul.f32 0.00390625, %v512_v3 }
  0xe5   : > { %v555_v18 = vmul.f32 %v550_v11, %v550_v11 }
  0xeb   : > { %v528_v61 = vpop.xlane.xlu0 %527 }
  0xec   : > { %v529_v62 = vrot.slane %v528_v61, 4 }
  0xee   : > { %v530_v63 = vadd.f32 %v529_v62, %v528_v61 }
  0xf0   : > { %v531_v0 = vrot.slane %v530_v63, 2 }
  0xf2   : > { %v532_v5 = vadd.f32 %v531_v0, %v530_v63 }
  0xf4   : > { %v533_v6 = vrot.slane %v532_v5, 1  ;;  %v516_v14 = vpop.xlane.xlu1 %515 }
  0xf5   : > { %v551_v15 = vmul.f32 0.00390625, %v516_v14 }
  0xf6   : > { %v534_v9 = vadd.f32 %v533_v6, %v532_v5 }
  0xf8   : > { %731 = vpush %v534_v9 }
  0xfd   : > { %v508_v10 = vpop.xlane.xlu0 %507 }
  0xfe   : > { %v549_v12 = vmul.f32 0.00390625, %v508_v10 }
 0x100   : > { %v552_v4 = vmul.f32 %v549_v12, %v549_v12  ;;  %v558_v8 = vmul.f32 %v550_v11, %v549_v12  ;;  %v560_v32 = vmul.f32 2.0, %v549_v12 }
 0x102   : > { %v553_v7 = vsub.f32 %v551_v15, %v552_v4  ;;  %v566_v23 = vadd.f32 %v555_v18, %v552_v4  ;;  %v561_v34 = vmul.f32 %v560_v32, %v550_v11 }
 0x104   : > { %v567_v28 = vadd.f32 0.0001, %v566_v23  ;;  %v562_v36 = vadd.f32 0.0001, %v561_v34 }
 0x105   : > { %v524_v25 = vpop.xlane.xlu1 %523 }
 0x106   : > { %v557_v27 = vmul.f32 0.00390625, %v524_v25 }
 0x108   : > { %v559_v31 = vsub.f32 %v557_v27, %v558_v8 }
 0x10a   : > { %v563_v33 = vmul.f32 2.0, %v559_v31 }
 0x10c   : > { %v564_v35 = vadd.f32 0.0009, %v563_v33 }
 0x10e   : > { %v565_v37 = vmul.f32 %v564_v35, %v562_v36 }
 0x10f   : > { %v520_v20 = vpop.xlane.xlu0 %519 }
 0x110   : > { %v554_v21 = vmul.f32 0.00390625, %v520_v20 }
 0x112   : > { %v556_v24 = vsub.f32 %v554_v21, %v555_v18 }
 0x114   : > { %v568_v26 = vadd.f32 %v556_v24, %v553_v7 }
 0x116   : > { %v569_v29 = vadd.f32 0.0009, %v568_v26 }
 0x118   : > { %v570_v30 = vmul.f32 %v569_v29, %v567_v28 }
 0x11a   : > { %810 = vrcp.f32 %v570_v30 }
 0x127   : > { %v811_v38 = vpop.eup %810 }
 0x128   : > { %v572_v19 = vmul.f32 %v811_v38, %v565_v37 }
 0x129   : > { %s732_s21 = spop %731 }
 0x12a   : > { %v574_v39 = vsel %vm573_vm5, %v572_v19, 0.0  ;;  %s536_s19 = smul.f32 0.00390625, %s732_s21  ;;  %s593_s21 = scalar_lea.sflag [#allocation5], %s1094_s25 }
 0x12b   : > { %575 = vadd.xlane.f32.xlu0 %v574_v39 }
 0x12c   : > { %s537_s28 = smul.f32 0.25, %s536_s19  ;;  %s872_s19 = scalar_lea.vmem %s607_s26, 32 }
 0x12d   : > { %p873_p0 = scmp.ne.s32.totalorder %s607_s26, %s872_s19 }
 0x12e   : > { %s538_s3 = smax.f32 %s963_s29, %s537_s28  ;;  %p547_p8 = scmp.gt.f32.partialorder %s537_s28, 0.0 }
 0x12f   : > { %v539_v40 = vstv %s538_s3  ;;  %p874_p2 = pnand %p873_p0, %p1031_p9  ;;  %s876_s28 = sshll.u32 %s964_s12, 4  ;;  %s877_s28 = int_to_ptr.vmem [resolvable:$false] %s876_s28 }
 0x130   : > { %812 = vrcp.f32 %v539_v40  ;;  %s878_s29 = scalar_lea.vmem %s877_s28, 64  ;;  %p879_p6 = scmp.lt.s32.totalorder %s607_s26, %s877_s28 }
 0x131   : > { %p875_p5 = pneg %p874_p2  ;;  %p880_p4 = scmp.lt.s32.totalorder %s878_s29, %s872_s19 }
 0x133   : > { %p881_p7 = por %p880_p4, %p879_p6 }
 0x135   : > { %p882_p10 = pnand %p881_p7, %p875_p5 }
 0x13d   : > { %v813_v41 = vpop.eup %812 }
 0x13e   : > { %733 = vpush %v813_v41 }
 0x16f   : > { %s734_s7 = spop %733 }
 0x170   : > { %v542_v1 = vstv %s734_s7 }
 0x171   : > { %814 = vlog2.f32 %v542_v1 }
 0x17e   : > { %v815_v13 = vpop.eup %814 }
 0x17f   : > { %v544_v42 = vmul.f32 0.6931472, %v815_v13 }
 0x181   : > { %735 = vpush %v544_v42 }
 0x1b2   : > { %s736_s8 = spop %735 }
 0x1b3   : > { %s546_s16 = smul.f32 4.3429446, %s736_s8 }
 0x1b4   : > { %v576_v43 = vpop.xlane.xlu0 %575 }
 0x1b5   : > { %v577_v44 = vrot.slane %v576_v43, 4  ;;  %s1287_s16 = smov (!%p547_p8, %s546_s16), inf }
 0x1b6   : > { %v588_v49 = vstv %s1287_s16 }
 0x1b7   : > { %v578_v2 = vadd.f32 %v577_v44, %v576_v43 }
 0x1b9   : > { %v579_v16 = vrot.slane %v578_v2, 2 }
 0x1bb   : > { %v580_v17 = vadd.f32 %v579_v16, %v578_v2 }
 0x1bd   : > { %v581_v45 = vrot.slane %v580_v17, 1 }
 0x1bf   : > { %v582_v46 = vadd.f32 %v581_v45, %v580_v17 }
 0x1c1   : > { %737 = vpush %v582_v46 }
 0x1f2   : > { %s738_s4 = spop %737 }
 0x1f3   : > { %s584_s6 = smul.f32 0.25, %s738_s4 }
 0x1f5   : > { %v589_v22 = vstv %s584_s6 }
 0x1f6   : > { %v590_v50 = vsel %vm587_vm6, %v588_v49, %v589_v22 }
 0x1f7   : > { %591 = vst [vmem:[%s219_s27] sm:$0x3] %v590_v50 }
 0x1f8   : > { %885 = shalt.err (!%p882_p10)
}
 0x1f9   : > { %s886_s3 = scalar_lea.hbm %s1228_s18, 32  ;;  %s890_s8 = scalar_lea.hbm %s1272_s2, 64 }
 0x1fa   : > { %p887_p1 = scmp.ne.s32.totalorder %s1228_s18, %s886_s3  ;;  %p891_p8 = scmp.lt.s32.totalorder %s1228_s18, %s1272_s2 }
 0x1fb   : > { %p892_p0 = scmp.lt.s32.totalorder %s890_s8, %s886_s3 }
 0x1fc   : > { %p888_p13 = pnand %p887_p1, %p1031_p9 }
 0x1fd   : > { %p893_p2 = por %p892_p0, %p891_p8 }
 0x1fe   : > { %p889_p3 = pneg %p888_p13 }
 0x200   : > { %p894_p5 = pnand %p893_p2, %p889_p3 }
 0x202   : > { %897 = shalt.err (!%p894_p5)
}
 0x203   : > { %743 = dma.vmem_to_hbm [thread:$0]  (%p1031_p9), %s607_s26, 32, %s1228_s18, %s593_s21  }
 0x204 PF: > { %s618_s30 = sand.u32 1, %s936_s9   ;;  %p753_p6 = pnand %p714_p12, %p1038_p11 }
 0x205   : > { %s619_s4 = scalar_lea.sflag [#allocation5], %s618_s30 }
 0x206   : > { %p754_p4 = pneg %p753_p6 }
 0x208   : > { %931 = dma.done.wait (%p754_p4), %s619_s4, 32  }
 0x209   : > { %933 = vsyncadd (%p754_p4), %s619_s4, 4294967264  ;;  %s21_s14 = sadd.s32 1, %s956_s14   ;;  %s1279_s9 = smov %s940_s10 }
 0x20a   : > { %p18_p7 = scmp.ge.s32.totalorder %s21_s14, 4   ;;  %s1280_s10 = smov %s944_s11 }
 0x20b   : > { %s1281_s11 = smov %s1036_s23  ;;  %s1282_s12 = smov %s952_s13 }
 0x20c   : > { %s1283_s13 = smov %s1285_s17  ;;  %20 = sbr.rel (!%p18_p7) target bundleno = 8 (0x8), region = 99 }
 0x211   :  { %624 = vsyncpa [#allocation4], 1 }
 0x212   :  { %626 = vsyncpa [#allocation4 + $0x1], 1 }
 0x213   :  { %627 = vsyncpa [#allocation7], 1 }
 0x214   :  { %629 = vsyncpa [#allocation7 + $0x1], 1 }
 0x215   :  { %630 = vsyncpa [#allocation5], 1 }
 0x216   :  { %632 = vsyncpa [#allocation5 + $0x1], 1 }

</bundles_post_ra>
